<compile_context>
chip_gen: v7x
topology: tpu7x:2x2x1
jax: 0.10.0
libtpu: 0.0.40
codegen_flags: <defaults>
</compile_context>

<pallas_src>
import numpy as np
import jax
import jax.numpy as jnp
from jax.experimental import pallas as pl
from jax.experimental.pallas import tpu as pltpu


# ---------------------------------------------------------------------------
# FilterbankShape.lin_tri_filter_shape (deterministic, numpy) — same math as
# the original lseqsleepnet FilterbankShape helper.
# ---------------------------------------------------------------------------
def lin_tri_filter_shape(nfilt=20, nfft=512, samplerate=16000, lowfreq=0, highfreq=None):
    highfreq = highfreq or samplerate / 2
    hzpoints = np.linspace(lowfreq, highfreq, nfilt + 2)
    bins = np.floor((nfft + 1) * hzpoints / samplerate)
    fbank = np.zeros([nfilt, nfft // 2 + 1], dtype=np.float64)
    for j in range(nfilt):
        for i in range(int(bins[j]), int(bins[j + 1])):
            fbank[j, i] = (i - bins[j]) / (bins[j + 1] - bins[j])
        for i in range(int(bins[j + 1]), int(bins[j + 2])):
            fbank[j, i] = (bins[j + 2] - i) / (bins[j + 2] - bins[j + 1])
    fbank = np.transpose(fbank)  # (nfft//2+1, nfilt) = (129, nfilt)
    return fbank.astype(np.float32)


# ---------------------------------------------------------------------------
# Pallas kernel: one (epoch-tile, time-tile) step, all channels at once.
#   x_ref  : (bn, C, tt, F)      f32  spectrogram tile in native layout
#   fb_ref : (C, F, nfilt)       bf16 hoisted sigmoid(W)*Tri, resident (constant index_map)
#   o_ref  : (bn, tt, Kc_pad)    f32  lane-dense output tile in the final cat layout
# ---------------------------------------------------------------------------
def _lfb_kernel(x_ref, fb_ref, o_ref):
    bn, C, tt, F = x_ref.shape
    nf = fb_ref.shape[-1]
    Kc = C * nf
    Kc_pad = o_ref.shape[-1]
    rows = bn * tt

    for c in range(C):  # C is tiny & static -> unrolled at trace time
        # Reshape before the cast: merging (bn, tt) -> rows is layout-free when tt % 8 == 0.
        # bf16 operands feed the MXU at full rate; accumulation stays f32.
        xc = x_ref[:, c, :, :].reshape(rows, F).astype(jnp.bfloat16)
        y = jnp.dot(xc, fb_ref[c], preferred_element_type=jnp.float32)   # (rows, nf)
        # Disjoint static lane slice per channel: no cross-channel add chain, no block-diag
        # MXU waste; HBM writeback of the whole block remains a single unmasked wide store.
        o_ref[:, :, c * nf:(c + 1) * nf] = y.reshape(bn, tt, nf).astype(o_ref.dtype)

    if Kc_pad > Kc:  # zero the lane padding so the padded HBM lanes are deterministic
        o_ref[:, :, Kc:] = jnp.zeros((bn, tt, Kc_pad - Kc), o_ref.dtype)


# ---------------------------------------------------------------------------
# Tile selection (generation-aware row target + VMEM guard).
# ---------------------------------------------------------------------------
def _round_up(a, m):
    return ((a + m - 1) // m) * m


def _row_target():
    try:
        kind = jax.devices()[0].device_kind.lower()
    except Exception:
        kind = ""
    # v7x: 3.2 TB/s HBM -> bigger row tiles amortize the ~0.35us per-step overhead.
    return 2048 if ("v7" in kind or "tpu7" in kind) else 1024


def _choose_tiles(N, C, T, F, Kc_pad, budget_bytes=28 << 20):
    F_pad = _round_up(F, 128)              # lane padding of the x block in VMEM

    if T <= 512:
        tt = T                             # full dim is always a legal block extent
    else:
        tt = 512                           # multiple of 8; pl.cdiv grid handles a ragged edge
        for cand in range(512, 7, -8):     # prefer an exact multiple-of-8 divisor of T
            if T % cand == 0:
                tt = cand
                break

    bn = max(1, min(N, _row_target() // max(tt, 1)))

    def blk_bytes(bn_, tt_):
        tt_p = _round_up(tt_, 8)
        x_blk = bn_ * C * tt_p * F_pad * 4          # f32 input tile
        o_blk = bn_ * tt_p * Kc_pad * 4             # f32 output tile
        return 2 * (x_blk + o_blk)                  # double-buffered by the pipeline

    while bn > 1 and blk_bytes(bn, tt) > budget_bytes:
        bn -= 1
    while tt > 8 and blk_bytes(bn, tt) > budget_bytes:
        tt = max(8, _round_up(tt // 2, 8))
    return bn, tt


def learnable_filterbank(x, filter_weights, triangular_matrix):
    """Pallas implementation of LearnableFilterbank.forward.

    x                 : (N, C, T, F) float32   (F must equal triangular_matrix.shape[0])
    filter_weights    : (nfilt, C)   float32
    triangular_matrix : (F, nfilt)   float32
    returns           : (N, T, C * nfilt) float32   (== torch.cat(chnls, dim=2))
    """
    N, C, T, F = x.shape
    Ft, nfilt = triangular_matrix.shape
    assert F == Ft, f"freq dim mismatch: x has {F}, filterbank expects {Ft}"
    assert filter_weights.shape == (nfilt, C)
    Kc = C * nfilt
    Kc_pad = _round_up(Kc, 128)            # lane-dense output even when C*nfilt != 128

    # Hoisted per-channel filterbank sigmoid(W[:, c]) * Tri, cast once to bf16 (MXU operands).
    # Note: bf16 operands (f32 accumulation) trade a few e-3 abs error for MXU headroom; use
    # f32 + precision=HIGHEST here and in the kernel if bit-parity with torch f32 is required.
    fb = jax.nn.sigmoid(filter_weights).T[:, None, :] * triangular_matrix[None, :, :]  # (C, F, nfilt)
    fb = fb.astype(jnp.bfloat16)

    bn, tt = _choose_tiles(N, C, T, F, Kc_pad)
    grid = (pl.cdiv(N, bn), pl.cdiv(T, tt))

    out = pl.pallas_call(
        _lfb_kernel,
        out_shape=jax.ShapeDtypeStruct((N, T, Kc_pad), jnp.float32),
        grid_spec=pltpu.PrefetchScalarGridSpec(
            num_scalar_prefetch=0,
            grid=grid,
            in_specs=[
                # x in native (N, C, T, F) layout: no wrapper transpose / extra HBM pass.
                pl.BlockSpec((bn, C, tt, F), lambda i, j: (i, 0, j, 0)),
                # Tiny filterbank, resident across all grid steps (constant index_map).
                pl.BlockSpec((C, F, nfilt), lambda i, j: (0, 0, 0)),
            ],
            # Lane-dense output slab, already in the final (N, T, C*nfilt) cat layout.
            out_specs=pl.BlockSpec((bn, tt, Kc_pad), lambda i, j: (i, j, 0)),
        ),
        compiler_params=pltpu.CompilerParams(
            dimension_semantics=("parallel", "parallel"),
            vmem_limit_bytes=40 << 20,
        ),
    )(x, fb)

    return out if Kc_pad == Kc else out[..., :Kc]


def multiple_epoch_encoder_filterbank(x5d, filter_weights, triangular_matrix):
    """Filterbank stage of MultipleEpochEncoder.forward.

    x5d: (num_batches, num_epochs, C, T, F) -> (num_batches*num_epochs, T, C*nfilt)
    Matches `torch.reshape(x, (-1, C, T, F))` followed by LearnableFilterbank.forward.
    """
    B, E, C, T, F = x5d.shape
    x = x5d.reshape(B * E, C, T, F)  # free reshape (leading dims), same as torch.reshape
    return learnable_filterbank(x, filter_weights, triangular_matrix)
    # TODO(synk): BLSTM_Layer -> Attention_Layer -> reshape(-1, E, 2*hidden) stages not implemented
    # (BLSTM_Layer is not defined in the provided module spec).


def _reference(x, filter_weights, triangular_matrix):
    """Plain-JAX f32 replica of the PyTorch LearnableFilterbank forward, for verification."""
    N, C, T, F = x.shape
    chnls = []
    for c in range(C):
        fb = jax.nn.sigmoid(filter_weights[:, c]) * triangular_matrix  # (F, nfilt)
        chnls.append(jnp.matmul(x[:, c, :, :], fb))                    # (N, T, nfilt)
    return jnp.concatenate(chnls, axis=2)


if __name__ == "__main__":
    # Module hyperparameters (small but consistent: freq dim is nfft//2+1 = 129,
    # and C * num_filters = 128 so the padded output last dim is exactly one lane tile).
    num_filters = 32
    num_channels = 4
    num_batches = 2
    num_epochs = 4
    time_frames = 16
    nfft = 256
    freq_bins = nfft // 2 + 1  # 129

    key = jax.random.PRNGKey(0)
    k_x, k_w = jax.random.split(key)
    x5d = jax.random.normal(
        k_x, (num_batches, num_epochs, num_channels, time_frames, freq_bins), dtype=jnp.float32)
    filter_weights = jax.random.normal(k_w, (num_filters, num_channels), dtype=jnp.float32)
    triangular_matrix = jnp.asarray(
        lin_tri_filter_shape(nfilt=num_filters, nfft=nfft, samplerate=100, lowfreq=0, highfreq=50)
    )  # (129, num_filters)

    out = multiple_epoch_encoder_filterbank(x5d, filter_weights, triangular_matrix)
    out = jax.block_until_ready(out)

    x4d = x5d.reshape(num_batches * num_epochs, num_channels, time_frames, freq_bins)
    ref = _reference(x4d, filter_weights, triangular_matrix)

    assert out.shape == (num_batches * num_epochs, time_frames, num_channels * num_filters), out.shape
    # bf16 MXU operands (f32 accumulation) vs. the f32 reference -> tolerate a few e-3 abs error.
    max_err = float(jnp.max(jnp.abs(out - ref)))
    assert jnp.allclose(out, ref, atol=5e-2, rtol=5e-2), max_err

    print("KERNEL_OK")
</pallas_src>

<mosaic_0001>
module attributes {stable_mosaic.version = 11 : i64} {
  func.func @_lfb_kernel(%arg0: i32, %arg1: i32, %arg2: memref<8x4x16x129xf32, #tpu.memory_space<vmem>>, %arg3: memref<4x129x32xbf16, #tpu.memory_space<vmem>>, %arg4: memref<8x16x128xf32, #tpu.memory_space<vmem>>) attributes {dimension_semantics = [#tpu.dimension_semantics<parallel>, #tpu.dimension_semantics<parallel>], iteration_bounds = array<i64: 1, 1>, scalar_prefetch = 0 : i64, scratch_operands = 0 : i64, tpu.core_type = #tpu.core_type<tc>, window_params = [{transform_indices = @transform_0, window_bounds = array<i64: 8, 4, 16, 129>}, {pipeline_mode = #tpu.pipeline_mode<synchronous>, transform_indices = @transform_1, window_bounds = array<i64: 4, 129, 32>}, {transform_indices = @transform_2, window_bounds = array<i64: 8, 16, 128>}]} {
    %c0 = arith.constant 0 : index
    %c0_0 = arith.constant 0 : index
    %c0_1 = arith.constant 0 : index
    %c0_2 = arith.constant 0 : index
    %0 = vector.load %arg2[%c0, %c0_0, %c0_1, %c0_2] : memref<8x4x16x129xf32, #tpu.memory_space<vmem>>, vector<8x1x16x129xf32>
    %1 = vector.shape_cast %0 : vector<8x1x16x129xf32> to vector<8x16x129xf32>
    %2 = vector.shape_cast %1 : vector<8x16x129xf32> to vector<128x129xf32>
    %3 = arith.truncf %2 : vector<128x129xf32> to vector<128x129xbf16>
    %c0_3 = arith.constant 0 : index
    %c0_4 = arith.constant 0 : index
    %c0_5 = arith.constant 0 : index
    %4 = vector.load %arg3[%c0_3, %c0_4, %c0_5] : memref<4x129x32xbf16, #tpu.memory_space<vmem>>, vector<1x129x32xbf16>
    %5 = vector.shape_cast %4 : vector<1x129x32xbf16> to vector<129x32xbf16>
    %cst = arith.constant dense<0.000000e+00> : vector<128x32xf32>
    %6 = tpu.matmul %3, %5, %cst {dimension_numbers = #tpu.dot_dimension_numbers<[1], [0], [0], [1], [0, 0, 1, 1], [], []>} : vector<128x129xbf16>, vector<129x32xbf16>, vector<128x32xf32> -> vector<128x32xf32>
    %7 = vector.shape_cast %6 : vector<128x32xf32> to vector<8x16x32xf32>
    %c0_6 = arith.constant 0 : index
    %c0_7 = arith.constant 0 : index
    %c0_8 = arith.constant 0 : index
    %8 = vector.load %arg4[%c0_6, %c0_7, %c0_8] : memref<8x16x128xf32, #tpu.memory_space<vmem>>, vector<8x16x32xf32>
    tpu.vector_store %arg4[%c0_6, %c0_7, %c0_8], %7 {strides = array<i32>} : memref<8x16x128xf32, #tpu.memory_space<vmem>>, vector<8x16x32xf32>,
    %c0_9 = arith.constant 0 : index
    %c1 = arith.constant 1 : index
    %c0_10 = arith.constant 0 : index
    %c0_11 = arith.constant 0 : index
    %9 = vector.load %arg2[%c0_9, %c1, %c0_10, %c0_11] : memref<8x4x16x129xf32, #tpu.memory_space<vmem>>, vector<8x1x16x129xf32>
    %10 = vector.shape_cast %9 : vector<8x1x16x129xf32> to vector<8x16x129xf32>
    %11 = vector.shape_cast %10 : vector<8x16x129xf32> to vector<128x129xf32>
    %12 = arith.truncf %11 : vector<128x129xf32> to vector<128x129xbf16>
    %c1_12 = arith.constant 1 : index
    %c0_13 = arith.constant 0 : index
    %c0_14 = arith.constant 0 : index
    %13 = vector.load %arg3[%c1_12, %c0_13, %c0_14] : memref<4x129x32xbf16, #tpu.memory_space<vmem>>, vector<1x129x32xbf16>
    %14 = vector.shape_cast %13 : vector<1x129x32xbf16> to vector<129x32xbf16>
    %cst_15 = arith.constant dense<0.000000e+00> : vector<128x32xf32>
    %15 = tpu.matmul %12, %14, %cst_15 {dimension_numbers = #tpu.dot_dimension_numbers<[1], [0], [0], [1], [0, 0, 1, 1], [], []>} : vector<128x129xbf16>, vector<129x32xbf16>, vector<128x32xf32> -> vector<128x32xf32>
    %16 = vector.shape_cast %15 : vector<128x32xf32> to vector<8x16x32xf32>
    %c0_16 = arith.constant 0 : index
    %c0_17 = arith.constant 0 : index
    %c32 = arith.constant 32 : index
    %17 = vector.load %arg4[%c0_16, %c0_17, %c32] : memref<8x16x128xf32, #tpu.memory_space<vmem>>, vector<8x16x32xf32>
    tpu.vector_store %arg4[%c0_16, %c0_17, %c32], %16 {strides = array<i32>} : memref<8x16x128xf32, #tpu.memory_space<vmem>>, vector<8x16x32xf32>,
    %c0_18 = arith.constant 0 : index
    %c2 = arith.constant 2 : index
    %c0_19 = arith.constant 0 : index
    %c0_20 = arith.constant 0 : index
    %18 = vector.load %arg2[%c0_18, %c2, %c0_19, %c0_20] : memref<8x4x16x129xf32, #tpu.memory_space<vmem>>, vector<8x1x16x129xf32>
    %19 = vector.shape_cast %18 : vector<8x1x16x129xf32> to vector<8x16x129xf32>
    %20 = vector.shape_cast %19 : vector<8x16x129xf32> to vector<128x129xf32>
    %21 = arith.truncf %20 : vector<128x129xf32> to vector<128x129xbf16>
    %c2_21 = arith.constant 2 : index
    %c0_22 = arith.constant 0 : index
    %c0_23 = arith.constant 0 : index
    %22 = vector.load %arg3[%c2_21, %c0_22, %c0_23] : memref<4x129x32xbf16, #tpu.memory_space<vmem>>, vector<1x129x32xbf16>
    %23 = vector.shape_cast %22 : vector<1x129x32xbf16> to vector<129x32xbf16>
    %cst_24 = arith.constant dense<0.000000e+00> : vector<128x32xf32>
    %24 = tpu.matmul %21, %23, %cst_24 {dimension_numbers = #tpu.dot_dimension_numbers<[1], [0], [0], [1], [0, 0, 1, 1], [], []>} : vector<128x129xbf16>, vector<129x32xbf16>, vector<128x32xf32> -> vector<128x32xf32>
    %25 = vector.shape_cast %24 : vector<128x32xf32> to vector<8x16x32xf32>
    %c0_25 = arith.constant 0 : index
    %c0_26 = arith.constant 0 : index
    %c64 = arith.constant 64 : index
    %26 = vector.load %arg4[%c0_25, %c0_26, %c64] : memref<8x16x128xf32, #tpu.memory_space<vmem>>, vector<8x16x32xf32>
    tpu.vector_store %arg4[%c0_25, %c0_26, %c64], %25 {strides = array<i32>} : memref<8x16x128xf32, #tpu.memory_space<vmem>>, vector<8x16x32xf32>,
    %c0_27 = arith.constant 0 : index
    %c3 = arith.constant 3 : index
    %c0_28 = arith.constant 0 : index
    %c0_29 = arith.constant 0 : index
    %27 = vector.load %arg2[%c0_27, %c3, %c0_28, %c0_29] : memref<8x4x16x129xf32, #tpu.memory_space<vmem>>, vector<8x1x16x129xf32>
    %28 = vector.shape_cast %27 : vector<8x1x16x129xf32> to vector<8x16x129xf32>
    %29 = vector.shape_cast %28 : vector<8x16x129xf32> to vector<128x129xf32>
    %30 = arith.truncf %29 : vector<128x129xf32> to vector<128x129xbf16>
    %c3_30 = arith.constant 3 : index
    %c0_31 = arith.constant 0 : index
    %c0_32 = arith.constant 0 : index
    %31 = vector.load %arg3[%c3_30, %c0_31, %c0_32] : memref<4x129x32xbf16, #tpu.memory_space<vmem>>, vector<1x129x32xbf16>
    %32 = vector.shape_cast %31 : vector<1x129x32xbf16> to vector<129x32xbf16>
    %cst_33 = arith.constant dense<0.000000e+00> : vector<128x32xf32>
    %33 = tpu.matmul %30, %32, %cst_33 {dimension_numbers = #tpu.dot_dimension_numbers<[1], [0], [0], [1], [0, 0, 1, 1], [], []>} : vector<128x129xbf16>, vector<129x32xbf16>, vector<128x32xf32> -> vector<128x32xf32>
    %34 = vector.shape_cast %33 : vector<128x32xf32> to vector<8x16x32xf32>
    %c0_34 = arith.constant 0 : index
    %c0_35 = arith.constant 0 : index
    %c96 = arith.constant 96 : index
    %35 = vector.load %arg4[%c0_34, %c0_35, %c96] : memref<8x16x128xf32, #tpu.memory_space<vmem>>, vector<8x16x32xf32>
    tpu.vector_store %arg4[%c0_34, %c0_35, %c96], %34 {strides = array<i32>} : memref<8x16x128xf32, #tpu.memory_space<vmem>>, vector<8x16x32xf32>,
    return
  }
  func.func @transform_0(%arg0: i32, %arg1: i32) -> (i32, i32, i32, i32) {
    %c0_i32 = arith.constant 0 : i32
    %c0_i32_0 = arith.constant 0 : i32
    %c0_i32_1 = arith.constant 0 : i32
    return %arg0, %c0_i32, %arg1, %c0_i32_0 : i32, i32, i32, i32
  }
  func.func @transform_1(%arg0: i32, %arg1: i32) -> (i32, i32, i32) {
    %c0_i32 = arith.constant 0 : i32
    %c0_i32_0 = arith.constant 0 : i32
    %c0_i32_1 = arith.constant 0 : i32
    %c0_i32_2 = arith.constant 0 : i32
    return %c0_i32, %c0_i32_0, %c0_i32_1 : i32, i32, i32
  }
  func.func @transform_2(%arg0: i32, %arg1: i32) -> (i32, i32, i32) {
    %c0_i32 = arith.constant 0 : i32
    %c0_i32_0 = arith.constant 0 : i32
    return %arg0, %arg1, %c0_i32 : i32, i32, i32
  }
}

</mosaic_0001>

<bundles_post_ra>
// kernel: tpu_custom_call.1
= control target key start
LH: loop header
LB: loop body
LE: loop exit
PB: predicated region body
PF: predicated region fallthrough
CT: control target
= control target key end

     0   :  { %7 = vsyncpa [#allocation3], 0  ;;  %s1831_s0 = inlined_call_operand.hbm [shape: f32[8,4,16,129], index: 0, kind: input, shape index: {}]   ;;  %s1832_s1 = inlined_call_operand.vmem [shape: bf16[4,129,32], index: 1, kind: input, shape index: {}]   ;;  %s1833_s2 = inlined_call_operand.hbm [shape: f32[8,16,128], index: 2, kind: output, shape index: {}]  }
   0x1   :  { %8 = vsyncpa [#allocation4], 0  ;;  %s1487_s9 = smov [#allocation2]   ;;  %s1439_s13 = scalar_lea.hbm %s1831_s0, 16384 }
   0x2   :  { %s14_s10 = sshll.u32 %s1487_s9, 4  ;;  %p1440_p0 = scmp.ne.s32.totalorder %s1831_s0, %s1439_s13  ;;  %s15_s10 = int_to_ptr.vmem [resolvable:$true] %s14_s10 }
   0x3   :  { %p1443_p1 = scmp.lt.u32.totalorder %s1439_s13, %s1831_s0 }
   0x5   :  { %p1445_p2 = pnand %p1443_p1, %p1440_p0 }
   0x7   :  { %1448 = shalt.err (!%p1445_p2)
}
   0x8   :  { %s1449_s18 = scalar_lea.vmem %s15_s10, 16384  ;;  %p1454_p4 = scmp.lt.s32.totalorder %s15_s10, %s15_s10 }
   0x9   :  { %p1450_p3 = scmp.ne.s32.totalorder %s15_s10, %s1449_s18  ;;  %p1455_p5 = scmp.lt.s32.totalorder %s1449_s18, %s1449_s18 }
   0xb   :  { %p1456_p6 = por %p1455_p5, %p1454_p4 }
   0xd   :  { %p1457_p7 = pnand %p1456_p6, %p1450_p3 }
   0xf   :  { %1460 = shalt.err (!%p1457_p7)
}
  0x10   :  { %s1488_s19 = smov 256   ;;  %s1489_s20 = smov 16  }
  0x11   :  { %20 = dma.hbm_to_vmem [thread:$0]  %s1831_s0, 16384, %s15_s10, [#allocation3], %s1488_s19, %s1488_s19, %s1489_s20  }
  0x12   :  { %1483 = dma.done.wait [#allocation3], 16384  }
  0x13   :  { %1484 = vsyncadd [#allocation3], 4294950912  ;;  %v1490_v0 = vmov 0   ;;  %v1403_v1 = vld [vmem:[%s1832_s1] sm:$0xff]   ;;  %v1405_v3 = vld [vmem:[%s1832_s1 + $0x8] sm:$0xff]   ;;  %vm143_vm0 = vcmask 7168  }
  0x14   :  { %174 = vmatprep.subr.bf16.mxu0 %v1490_v0  ;;  %433 = vmatprep.subr.bf16.mxu1 %v1490_v0  ;;  %v1404_v2 = vld [vmem:[%s1832_s1 + $0x44] sm:$0xff]   ;;  %v1406_v4 = vld [vmem:[%s1832_s1 + $0x4c] sm:$0xff]   ;;  %v1408_v6 = vld [vmem:[%s1832_s1 + $0x54] sm:$0xff]   ;;  %vm168_vm1 = vcmask 1040384   ;;  %vm271_vm2 = vcmask 261120   ;;  %s1492_s8 = smov 64  }
  0x15   :  { %175 = vmatpush1.bf16.msra.mxu0 %v1403_v1  ;;  %434 = vmatpush1.bf16.msra.mxu1 %v1404_v2  ;;  %v1407_v5 = vld [vmem:[%s1832_s1 + $0x10] sm:$0xff]   ;;  %v1409_v7 = vld [vmem:[%s1832_s1 + $0x18] sm:$0xff]   ;;  %v1411_v9 = vld [vmem:[%s1832_s1 + $0x20] sm:$0xff]   ;;  %v1593_v24 = vsel %vm168_vm1, 65535, %v1490_v0  ;;  %s1493_s9 = smov 96   ;;  %vm594_vm3 = vcmask 523520  }
  0x16   :  { %176 = vmatprep.subr.bf16.mxu0 %v1490_v0  ;;  %435 = vmatprep.subr.bf16.mxu1 %v1490_v0  ;;  %v1410_v8 = vld [vmem:[%s1832_s1 + $0x5c] sm:$0xff]   ;;  %v1412_v10 = vld [vmem:[%s1832_s1 + $0x64] sm:$0xff]   ;;  %v1414_v16 = vld [vmem:[%s1832_s1 + $0x6c] sm:$0xff]   ;;  %vm917_vm4 = vcmask 785920   ;;  %vm1240_vm5 = vcmask 1048320   ;;  %s1494_s10 = smov [#allocation5]  }
  0x17   :  { %v28_v11 = vld [vmem:[#allocation2 + $0x8] sm:$0xff]  ;;  %v30_v12 = vld [vmem:[#allocation2 + $0x18] sm:$0xff]  ;;  %v1415_v19 = vld [vmem:[%s1832_s1 + $0x30] sm:$0xff]   ;;  %s1262_s11 = sshll.u32 %s1494_s10, 4  ;;  %s1263_s11 = int_to_ptr.vmem [resolvable:$true] %s1262_s11 }
  0x18   :  { %v1413_v13 = vld [vmem:[%s1832_s1 + $0x28] sm:$0xff]   ;;  %v60_v14 = vpack.c.bf16 %v30_v12, %v28_v11  ;;  %v292_v17 = vld [vmem:[#allocation2 + $0x38] sm:$0xff]  ;;  %v1419_v22 = vld [vmem:[%s1832_s1 + $0x40] ss:$0 sps:$4 sm:$0x11]   ;;  %s1461_s12 = scalar_lea.vmem %s1263_s11, 2048  ;;  %p1466_p9 = scmp.lt.s32.totalorder %s1263_s11, %s1263_s11 }
  0x19   :  { %177 = vmatpush1.bf16.msra.mxu0 %v1405_v3  ;;  %436 = vmatpush1.bf16.msra.mxu1 %v1406_v4  ;;  %v290_v15 = vld [vmem:[#allocation2 + $0x28] sm:$0xff]  ;;  %v1416_v20 = vld [vmem:[%s1832_s1 + $0x74] sm:$0xff]   ;;  %v1418_v23 = vld [vmem:[%s1832_s1 + $0x7c] sm:$0xff]   ;;  %v172_v27 = vand.u32 %v1419_v22, %v1593_v24  ;;  %p1462_p8 = scmp.ne.s32.totalorder %s1263_s11, %s1461_s12  ;;  %p1467_p10 = scmp.lt.s32.totalorder %s1461_s12, %s1461_s12 }
  0x1a   :  { %178 = vmatprep.subr.bf16.mxu0 %v1490_v0  ;;  %437 = vmatprep.subr.bf16.mxu1 %v1490_v0  ;;  %v322_v18 = vpack.c.bf16 %v292_v17, %v290_v15  ;;  %v1417_v21 = vld [vmem:[%s1832_s1 + $0x38] sm:$0xff]   ;;  %v1420_v25 = vld [vmem:[%s1832_s1 + $0x84] ss:$0 sps:$4 sm:$0x11]   ;;  %v29_v28 = vld [vmem:[#allocation2 + $0x10] sm:$0xff] }
  0x1b   :  { %1283 = vmatprep.mubr.msk.bf16.mxu0 %vm143_vm0, %v60_v14  ;;  %v27_v26 = vld [vmem:[#allocation2] sm:$0xff]  ;;  %v431_v29 = vand.u32 %v1420_v25, %v1593_v24  ;;  %v291_v31 = vld [vmem:[#allocation2 + $0x30] sm:$0xff]  ;;  %v32_v32 = vld [vmem:[#allocation2 + $0x88] sm:$0xff]  ;;  %p1468_p11 = por %p1467_p10, %p1466_p9 }
  0x1c   :  { %1317 = vmatprep.mubr.msk.bf16.mxu1 %vm143_vm0, %v322_v18  ;;  %v289_v30 = vld [vmem:[#allocation2 + $0x20] sm:$0xff]  ;;  %v34_v33 = vld [vmem:[#allocation2 + $0x98] sm:$0xff]  ;;  %v59_v34 = vpack.c.bf16 %v29_v28, %v27_v26  ;;  %v294_v35 = vld [vmem:[#allocation2 + $0xa8] sm:$0xff] }
  0x1d   :  { %179 = vmatpush1.bf16.msra.mxu0 %v1407_v5  ;;  %438 = vmatpush1.bf16.msra.mxu1 %v1408_v6  ;;  %v296_v36 = vld [vmem:[#allocation2 + $0xb8] sm:$0xff]  ;;  %v321_v37 = vpack.c.bf16 %v291_v31, %v289_v30  ;;  %v1421_v38 = vld [vmem:[%s1832_s1 + $0x88] sm:$0xff]   ;;  %v62_v40 = vpack.c.bf16 %v34_v33, %v32_v32  ;;  %v31_v41 = vld [vmem:[#allocation2 + $0x80] sm:$0xff]  ;;  %p1469_p12 = pnand %p1468_p11, %p1462_p8 }
  0x1e   :  { %180 = vmatprep.subr.bf16.mxu0 %v1490_v0  ;;  %439 = vmatprep.subr.bf16.mxu1 %v1490_v0  ;;  %v1422_v39 = vld [vmem:[%s1832_s1 + $0xcc] sm:$0xff]   ;;  %v324_v42 = vpack.c.bf16 %v296_v36, %v294_v35  ;;  %v293_v44 = vld [vmem:[#allocation2 + $0xa0] sm:$0xff]  ;;  %v1424_v47 = vld [vmem:[%s1832_s1 + $0xd4] sm:$0xff]  }
  0x1f   :  { %v33_v43 = vld [vmem:[#allocation2 + $0x90] sm:$0xff]  ;;  %v36_v48 = vld [vmem:[#allocation2 + $0x108] sm:$0xff]  ;;  %v38_v49 = vld [vmem:[#allocation2 + $0x118] sm:$0xff] }
  0x20   :  { %v295_v45 = vld [vmem:[#allocation2 + $0xb0] sm:$0xff]  ;;  %v298_v50 = vld [vmem:[#allocation2 + $0x128] sm:$0xff]  ;;  %v300_v51 = vld [vmem:[#allocation2 + $0x138] sm:$0xff]  ;;  %v61_v52 = vpack.c.bf16 %v33_v43, %v31_v41  ;;  %v64_v54 = vpack.c.bf16 %v38_v49, %v36_v48 }
  0x21   :  { %181 = vmatpush1.bf16.msra.mxu0 %v1409_v7  ;;  %440 = vmatpush1.bf16.msra.mxu1 %v1410_v8  ;;  %v1423_v46 = vld [vmem:[%s1832_s1 + $0x90] sm:$0xff]   ;;  %v323_v53 = vpack.c.bf16 %v295_v45, %v293_v44  ;;  %v1425_v55 = vld [vmem:[%s1832_s1 + $0x98] sm:$0xff]   ;;  %v326_v56 = vpack.c.bf16 %v300_v51, %v298_v50  ;;  %v35_v57 = vld [vmem:[#allocation2 + $0x100] sm:$0xff] }
  0x22   :  { %182 = vmatprep.subr.bf16.mxu0 %v1490_v0  ;;  %441 = vmatprep.subr.bf16.mxu1 %v1490_v0  ;;  %v37_v58 = vld [vmem:[#allocation2 + $0x110] sm:$0xff]  ;;  %v1426_v59 = vld [vmem:[%s1832_s1 + $0xdc] sm:$0xff]   ;;  %v40_v62 = vld [vmem:[#allocation2 + $0x188] sm:$0xff] }
  0x23   :  { %v297_v60 = vld [vmem:[#allocation2 + $0x120] sm:$0xff]  ;;  %v299_v61 = vld [vmem:[#allocation2 + $0x130] sm:$0xff]  ;;  %v42_v63 = vld [vmem:[#allocation2 + $0x198] sm:$0xff]  ;;  %v63_v5 = vpack.c.bf16 %v37_v58, %v35_v57 }
  0x24   :  { %v1427_v1 = vld [vmem:[%s1832_s1 + $0xa0] sm:$0xff]   ;;  %v302_v2 = vld [vmem:[#allocation2 + $0x1a8] sm:$0xff]  ;;  %v304_v3 = vld [vmem:[#allocation2 + $0x1b8] sm:$0xff]  ;;  %v325_v6 = vpack.c.bf16 %v299_v61, %v297_v60  ;;  %v66_v7 = vpack.c.bf16 %v42_v63, %v40_v62 }
  0x25   :  { %183 = vmatpush1.bf16.msra.mxu0 %v1411_v9  ;;  %442 = vmatpush1.bf16.msra.mxu1 %v1412_v10  ;;  %v1428_v4 = vld [vmem:[%s1832_s1 + $0xe4] sm:$0xff]   ;;  %v328_v8 = vpack.c.bf16 %v304_v3, %v302_v2  ;;  %v1430_v10 = vld [vmem:[%s1832_s1 + $0xec] sm:$0xff]   ;;  %v1433_v26 = vld [vmem:[%s1832_s1 + $0xb8] sm:$0xff]  }
  0x26   :  { %184 = vmatprep.subr.bf16.mxu0 %v1490_v0  ;;  %443 = vmatprep.subr.bf16.mxu1 %v1490_v0  ;;  %v1429_v9 = vld [vmem:[%s1832_s1 + $0xa8] sm:$0xff]   ;;  %v39_v11 = vld [vmem:[#allocation2 + $0x180] sm:$0xff]  ;;  %v41_v12 = vld [vmem:[#allocation2 + $0x190] sm:$0xff] }
  0x27   :  { %v303_v14 = vld [vmem:[#allocation2 + $0x1b0] sm:$0xff]  ;;  %v44_v15 = vld [vmem:[#allocation2 + $0x208] sm:$0xff]  ;;  %v43_v28 = vld [vmem:[#allocation2 + $0x200] sm:$0xff] }
  0x28   :  { %v1431_v17 = vld [vmem:[%s1832_s1 + $0xb0] sm:$0xff]   ;;  %v306_v18 = vld [vmem:[#allocation2 + $0x228] sm:$0xff]  ;;  %v305_v30 = vld [vmem:[#allocation2 + $0x220] sm:$0xff] }
  0x29   :  { %185 = vmatpush1.bf16.msra.mxu0 %v1413_v13  ;;  %444 = vmatpush1.bf16.msra.mxu1 %v1414_v16  ;;  %v301_v13 = vld [vmem:[#allocation2 + $0x1a0] sm:$0xff]  ;;  %v46_v16 = vld [vmem:[#allocation2 + $0x218] sm:$0xff]  ;;  %v307_v31 = vld [vmem:[#allocation2 + $0x230] sm:$0xff] }
  0x2a   :  { %186 = vmatprep.subr.bf16.mxu0 %v1490_v0  ;;  %445 = vmatprep.subr.bf16.mxu1 %v1490_v0  ;;  %v327_v22 = vpack.c.bf16 %v303_v14, %v301_v13  ;;  %v48_v32 = vld [vmem:[#allocation2 + $0x288] sm:$0xff]  ;;  %v50_v33 = vld [vmem:[#allocation2 + $0x298] sm:$0xff]  ;;  %v1435_v35 = vld [vmem:[%s1832_s1 + $0xc0] sm:$0xff]   ;;  %v329_v41 = vpack.c.bf16 %v307_v31, %v305_v30 }
  0x2b   :  { %v1437_v36 = vld [vmem:[%s1832_s1 + $0xc8] ss:$0 sps:$4 sm:$0x11]   ;;  %v309_v48 = vld [vmem:[#allocation2 + $0x2a0] sm:$0xff]  ;;  %v311_v49 = vld [vmem:[#allocation2 + $0x2b0] sm:$0xff] }
  0x2c   :  { %v754_v44 = vand.u32 %v1437_v36, %v1593_v24  ;;  %v52_v50 = vld [vmem:[#allocation2 + $0x308] sm:$0xff]  ;;  %v54_v51 = vld [vmem:[#allocation2 + $0x318] sm:$0xff]  ;;  %v53_v57 = vld [vmem:[#allocation2 + $0x310] sm:$0xff] }
  0x2d   :  { %187 = vmatpush1.bf16.msra.mxu0 %v1415_v19  ;;  %446 = vmatpush1.bf16.msra.mxu1 %v1416_v20  ;;  %v308_v19 = vld [vmem:[#allocation2 + $0x238] sm:$0xff]  ;;  %v313_v58 = vld [vmem:[#allocation2 + $0x320] sm:$0xff]  ;;  %v56_v60 = vld [vmem:[#allocation2 + $0x388] sm:$0xff] }
  0x2e   :  { %188 = vmatprep.subr.bf16.mxu0 %v1490_v0  ;;  %447 = vmatprep.subr.bf16.mxu1 %v1490_v0  ;;  %v1432_v20 = vld [vmem:[%s1832_s1 + $0xf4] sm:$0xff]   ;;  %v330_v25 = vpack.c.bf16 %v308_v19, %v306_v18  ;;  %v318_v62 = vld [vmem:[#allocation2 + $0x3a8] sm:$0xff]  ;;  %v935_v19 = vld [vmem:[#allocation2 + $0x60] sm:$0xff] }
  0x2f   :  { %v58_v61 = vld [vmem:[#allocation2 + $0x398] sm:$0xff]  ;;  %v614_v18 = vld [vmem:[#allocation2 + $0x50] sm:$0xff]  ;;  %v616_v30 = vld [vmem:[#allocation2 + $0xc0] sm:$0xff] }
  0x30   :  { %v320_v63 = vld [vmem:[#allocation2 + $0x3b8] sm:$0xff]  ;;  %v74_v3 = vpack.c.bf16 %v58_v61, %v56_v60  ;;  %v618_v31 = vld [vmem:[#allocation2 + $0xd0] sm:$0xff]  ;;  %v944_v36 = vld [vmem:[#allocation2 + $0x168] sm:$0xff] }
  0x31   :  { %189 = vmatpush1.bf16.msra.mxu0 %v1417_v21  ;;  %448 = vmatpush1.bf16.msra.mxu1 %v1418_v23  ;;  %v65_v21 = vpack.c.bf16 %v41_v12, %v39_v11  ;;  %v68_v23 = vpack.c.bf16 %v46_v16, %v44_v15  ;;  %v936_v11 = vld [vmem:[#allocation2 + $0x68] sm:$0xff]  ;;  %v938_v12 = vld [vmem:[#allocation2 + $0x78] sm:$0xff] }
  0x32   :  { %190 = vmatprep.subr.bf16.mxu0 %v1490_v0  ;;  %449 = vmatprep.subr.bf16.mxu1 %v1490_v0  ;;  %v968_v16 = vpack.c.bf16 %v938_v12, %v936_v11 }
  0x35   :  { %191 = vmatpush1.bf16.msra.mxu0 %v172_v27  ;;  %450 = vmatpush1.bf16.msra.mxu1 %v431_v29  ;;  %v1434_v27 = vld [vmem:[%s1832_s1 + $0xfc] sm:$0xff]   ;;  %v45_v29 = vld [vmem:[#allocation2 + $0x210] sm:$0xff] }
  0x36   :  { %756 = vmatprep.subr.bf16.mxu0 %v1490_v0  ;;  %1079 = vmatprep.subr.bf16.mxu1 %v1490_v0 }
  0x38   :  { %207 = vmatmul.mubr.bf16.vlgmr.msra.gmra.mrb[0].mxu0 %v59_v34  ;;  %466 = vmatmul.mubr.bf16.vlgmr.msra.gmra.mrb[0].mxu1 %v321_v37  ;;  %v310_v34 = vld [vmem:[#allocation2 + $0x2a8] sm:$0xff]  ;;  %v312_v37 = vld [vmem:[#allocation2 + $0x2b8] sm:$0xff] }
  0x39   :  { %757 = vmatpush1.bf16.msra.mxu0 %v1421_v38  ;;  %1080 = vmatpush1.bf16.msra.mxu1 %v1422_v39  ;;  %v1436_v38 = vld [vmem:[%s1832_s1 + $0x104] sm:$0xff]   ;;  %v1438_v39 = vld [vmem:[%s1832_s1 + $0x10c] ss:$0 sps:$4 sm:$0x11]   ;;  %v332_v43 = vpack.c.bf16 %v312_v37, %v310_v34  ;;  %v946_v37 = vld [vmem:[#allocation2 + $0x178] sm:$0xff]  ;;  %s1491_s1 = smov 32  }
  0x3a   :  { %1284 = vmatprep.mubr.msk.bf16.mxu0 %vm143_vm0, %v62_v40  ;;  %1318 = vmatprep.mubr.msk.bf16.mxu1 %vm143_vm0, %v324_v42  ;;  %v67_v40 = vpack.c.bf16 %v45_v29, %v43_v28  ;;  %v70_v42 = vpack.c.bf16 %v50_v33, %v48_v32  ;;  %v1077_v45 = vand.u32 %v1438_v39, %v1593_v24  ;;  %v939_v32 = vld [vmem:[#allocation2 + $0xe0] sm:$0xff]  ;;  %v941_v33 = vld [vmem:[#allocation2 + $0xf0] sm:$0xff]  ;;  %v621_v34 = vld [vmem:[#allocation2 + $0x148] sm:$0xff] }
  0x3b   :  { %758 = vmatprep.subr.bf16.mxu0 %v1490_v0  ;;  %1081 = vmatprep.subr.bf16.mxu1 %v1490_v0  ;;  %v331_v24 = vpack.c.bf16 %v311_v49, %v309_v48  ;;  %v969_v39 = vpack.c.bf16 %v941_v33, %v939_v32  ;;  %v948_v48 = vld [vmem:[#allocation2 + $0x1e8] sm:$0xff]  ;;  %v950_v49 = vld [vmem:[#allocation2 + $0x1f8] sm:$0xff] }
  0x3c   :  { %v964_v32 = vld [vmem:[#allocation2 + $0x3e8] sm:$0xff]  ;;  %v966_v33 = vld [vmem:[#allocation2 + $0x3f8] sm:$0xff] }
  0x3d   :  { %759 = vmatpush1.bf16.msra.mxu0 %v1423_v46  ;;  %1082 = vmatpush1.bf16.msra.mxu1 %v1424_v47  ;;  %v47_v46 = vld [vmem:[#allocation2 + $0x280] sm:$0xff]  ;;  %v49_v47 = vld [vmem:[#allocation2 + $0x290] sm:$0xff] }
  0x3e   :  { %760 = vmatprep.subr.bf16.mxu0 %v1490_v0  ;;  %1083 = vmatprep.subr.bf16.mxu1 %v1490_v0 }
  0x40   :  { %215 = vmatmul.mubr.bf16.gmra.mrb[4].mxu0 %v61_v52  ;;  %474 = vmatmul.mubr.bf16.gmra.mrb[4].mxu1 %v323_v53  ;;  %v314_v52 = vld [vmem:[#allocation2 + $0x328] sm:$0xff]  ;;  %v316_v53 = vld [vmem:[#allocation2 + $0x338] sm:$0xff] }
  0x41   :  { %1285 = vmatprep.mubr.msk.bf16.mxu0 %vm143_vm0, %v64_v54  ;;  %761 = vmatpush1.bf16.msra.mxu0 %v1425_v55  ;;  %v69_v54 = vpack.c.bf16 %v49_v47, %v47_v46  ;;  %v72_v55 = vpack.c.bf16 %v54_v51, %v52_v50  ;;  %v625_v46 = vld [vmem:[#allocation2 + $0x1c8] sm:$0xff]  ;;  %v627_v47 = vld [vmem:[#allocation2 + $0x1d8] sm:$0xff] }
  0x42   :  { %1319 = vmatprep.mubr.msk.bf16.mxu1 %vm143_vm0, %v326_v56  ;;  %1084 = vmatpush1.bf16.msra.mxu1 %v1426_v59  ;;  %v334_v56 = vpack.c.bf16 %v316_v53, %v314_v52  ;;  %v315_v59 = vld [vmem:[#allocation2 + $0x330] sm:$0xff]  ;;  %v651_v52 = vpack.c.bf16 %v627_v47, %v625_v46  ;;  %v974_v53 = vpack.c.bf16 %v950_v49, %v948_v48 }
  0x43   :  { %762 = vmatprep.subr.bf16.mxu0 %v1490_v0  ;;  %1085 = vmatprep.subr.bf16.mxu1 %v1490_v0  ;;  %v333_v2 = vpack.c.bf16 %v315_v59, %v313_v58  ;;  %v952_v58 = vld [vmem:[#allocation2 + $0x268] sm:$0xff]  ;;  %v954_v59 = vld [vmem:[#allocation2 + $0x278] sm:$0xff] }
  0x45   :  { %763 = vmatpush1.bf16.msra.mxu0 %v1427_v1 }
  0x46   :  { %1086 = vmatpush1.bf16.msra.mxu1 %v1428_v4  ;;  %764 = vmatprep.subr.bf16.mxu0 %v1490_v0  ;;  %v336_v4 = vpack.c.bf16 %v320_v63, %v318_v62  ;;  %v976_v63 = vpack.c.bf16 %v954_v59, %v952_v58 }
  0x47   :  { %1087 = vmatprep.subr.bf16.mxu1 %v1490_v0 }
  0x48   :  { %223 = vmatmul.mubr.bf16.gmra.mrb[8].mxu0 %v63_v5  ;;  %482 = vmatmul.mubr.bf16.gmra.mrb[8].mxu1 %v325_v6  ;;  %v55_v5 = vld [vmem:[#allocation2 + $0x380] sm:$0xff]  ;;  %v57_v6 = vld [vmem:[#allocation2 + $0x390] sm:$0xff] }
  0x49   :  { %1286 = vmatprep.mubr.msk.bf16.mxu0 %vm143_vm0, %v66_v7  ;;  %1320 = vmatprep.mubr.msk.bf16.mxu1 %vm143_vm0, %v328_v8  ;;  %v317_v7 = vld [vmem:[#allocation2 + $0x3a0] sm:$0xff]  ;;  %v319_v8 = vld [vmem:[#allocation2 + $0x3b0] sm:$0xff]  ;;  %v73_v13 = vpack.c.bf16 %v57_v6, %v55_v5  ;;  %v633_v5 = vld [vmem:[#allocation2 + $0x2c8] sm:$0xff] }
  0x4a   :  { %765 = vmatpush1.bf16.msra.mxu0 %v1429_v9  ;;  %1088 = vmatpush1.bf16.msra.mxu1 %v1430_v10  ;;  %v613_v9 = vld [vmem:[#allocation2 + $0x48] sm:$0xff]  ;;  %v615_v10 = vld [vmem:[#allocation2 + $0x58] sm:$0xff]  ;;  %v335_v14 = vpack.c.bf16 %v319_v8, %v317_v7 }
  0x4b   :  { %766 = vmatprep.subr.bf16.mxu0 %v1490_v0  ;;  %1089 = vmatprep.subr.bf16.mxu1 %v1490_v0  ;;  %v645_v15 = vpack.c.bf16 %v615_v10, %v613_v9  ;;  %v635_v6 = vld [vmem:[#allocation2 + $0x2d8] sm:$0xff]  ;;  %v956_v7 = vld [vmem:[#allocation2 + $0x2e8] sm:$0xff] }
  0x4c   :  { %v958_v8 = vld [vmem:[#allocation2 + $0x2f8] sm:$0xff]  ;;  %v655_v11 = vpack.c.bf16 %v635_v6, %v633_v5 }
  0x4d   :  { %v978_v12 = vpack.c.bf16 %v958_v8, %v956_v7 }
  0x4e   :  { %767 = vmatpush1.bf16.msra.mxu0 %v1431_v17  ;;  %1090 = vmatpush1.bf16.msra.mxu1 %v1432_v20  ;;  %v612_v17 = vld [vmem:[#allocation2 + $0x40] sm:$0xff]  ;;  %v937_v20 = vld [vmem:[#allocation2 + $0x70] sm:$0xff] }
  0x4f   :  { %768 = vmatprep.subr.bf16.mxu0 %v1490_v0  ;;  %1091 = vmatprep.subr.bf16.mxu1 %v1490_v0 }
  0x50   :  { %231 = vmatmul.mubr.bf16.gmra.mrb[12].mxu0 %v65_v21  ;;  %490 = vmatmul.mubr.bf16.gmra.mrb[12].mxu1 %v327_v22  ;;  %v617_v21 = vld [vmem:[#allocation2 + $0xc8] sm:$0xff]  ;;  %v619_v22 = vld [vmem:[#allocation2 + $0xd8] sm:$0xff] }
  0x51   :  { %1287 = vmatprep.mubr.msk.bf16.mxu0 %vm143_vm0, %v68_v23  ;;  %1321 = vmatprep.mubr.msk.bf16.mxu1 %vm143_vm0, %v330_v25  ;;  %v940_v23 = vld [vmem:[#allocation2 + $0xe8] sm:$0xff]  ;;  %v942_v25 = vld [vmem:[#allocation2 + $0xf8] sm:$0xff]  ;;  %v647_v28 = vpack.c.bf16 %v619_v22, %v617_v21 }
  0x52   :  { %769 = vmatpush1.bf16.msra.mxu0 %v1433_v26  ;;  %1092 = vmatpush1.bf16.msra.mxu1 %v1434_v27  ;;  %v644_v26 = vpack.c.bf16 %v614_v18, %v612_v17  ;;  %v967_v27 = vpack.c.bf16 %v937_v20, %v935_v19  ;;  %v970_v29 = vpack.c.bf16 %v942_v25, %v940_v23  ;;  %v637_v17 = vld [vmem:[#allocation2 + $0x348] sm:$0xff]  ;;  %v639_v18 = vld [vmem:[#allocation2 + $0x358] sm:$0xff] }
  0x53   :  { %770 = vmatprep.subr.bf16.mxu0 %v1490_v0  ;;  %1093 = vmatprep.subr.bf16.mxu1 %v1490_v0  ;;  %v960_v19 = vld [vmem:[#allocation2 + $0x368] sm:$0xff]  ;;  %v962_v20 = vld [vmem:[#allocation2 + $0x378] sm:$0xff]  ;;  %v657_v23 = vpack.c.bf16 %v639_v18, %v637_v17 }
  0x54   :  { %v980_v25 = vpack.c.bf16 %v962_v20, %v960_v19 }
  0x56   :  { %771 = vmatpush1.bf16.msra.mxu0 %v1435_v35  ;;  %1094 = vmatpush1.bf16.msra.mxu1 %v1436_v38  ;;  %v623_v35 = vld [vmem:[#allocation2 + $0x158] sm:$0xff]  ;;  %v646_v38 = vpack.c.bf16 %v618_v31, %v616_v30  ;;  %v641_v30 = vld [vmem:[#allocation2 + $0x3c8] sm:$0xff] }
  0x57   :  { %772 = vmatprep.subr.bf16.mxu0 %v1490_v0  ;;  %1095 = vmatprep.subr.bf16.mxu1 %v1490_v0  ;;  %v51_v0 = vld [vmem:[#allocation2 + $0x300] sm:$0xff]  ;;  %v643_v31 = vld [vmem:[#allocation2 + $0x3d8] sm:$0xff] }
  0x58   :  { %239 = vmatmul.mubr.bf16.gmra.mrb[16].mxu0 %v67_v40  ;;  %498 = vmatmul.mubr.bf16.gmra.mrb[16].mxu1 %v329_v41  ;;  %v71_v1 = vpack.c.bf16 %v53_v57, %v51_v0  ;;  %v649_v40 = vpack.c.bf16 %v623_v35, %v621_v34  ;;  %v972_v41 = vpack.c.bf16 %v946_v37, %v944_v36  ;;  %v629_v0 = vld [vmem:[#allocation2 + $0x248] sm:$0xff]  ;;  %v631_v57 = vld [vmem:[#allocation2 + $0x258] sm:$0xff] }
  0x59   :  { %1288 = vmatprep.mubr.msk.bf16.mxu0 %vm143_vm0, %v70_v42  ;;  %1322 = vmatprep.mubr.msk.bf16.mxu1 %vm143_vm0, %v332_v43  ;;  %v620_v42 = vld [vmem:[#allocation2 + $0x140] sm:$0xff]  ;;  %v622_v43 = vld [vmem:[#allocation2 + $0x150] sm:$0xff]  ;;  %v653_v62 = vpack.c.bf16 %v631_v57, %v629_v0  ;;  %v659_v36 = vpack.c.bf16 %v643_v31, %v641_v30  ;;  %v982_v37 = vpack.c.bf16 %v966_v33, %v964_v32 }
  0x5a   :  { %773 = vmatpush1.bf16.msra.mxu0 %v754_v44  ;;  %1096 = vmatpush1.bf16.msra.mxu1 %v1077_v45  ;;  %v943_v44 = vld [vmem:[#allocation2 + $0x160] sm:$0xff]  ;;  %v945_v45 = vld [vmem:[#allocation2 + $0x170] sm:$0xff]  ;;  %v648_v50 = vpack.c.bf16 %v622_v43, %v620_v42 }
  0x5b   :  { %v971_v51 = vpack.c.bf16 %v945_v45, %v943_v44 }
  0x60   :  { %247 = vmatmul.mubr.bf16.gmra.mrb[20].mxu0 %v69_v54  ;;  %506 = vmatmul.mubr.bf16.gmra.mrb[20].mxu1 %v331_v24  ;;  %v624_v54 = vld [vmem:[#allocation2 + $0x1c0] sm:$0xff]  ;;  %v626_v24 = vld [vmem:[#allocation2 + $0x1d0] sm:$0xff] }
  0x61   :  { %1289 = vmatprep.mubr.msk.bf16.mxu0 %vm143_vm0, %v72_v55  ;;  %1323 = vmatprep.mubr.msk.bf16.mxu1 %vm143_vm0, %v334_v56  ;;  %v947_v55 = vld [vmem:[#allocation2 + $0x1e0] sm:$0xff]  ;;  %v949_v56 = vld [vmem:[#allocation2 + $0x1f0] sm:$0xff]  ;;  %v650_v60 = vpack.c.bf16 %v626_v24, %v624_v54 }
  0x62   :  { %v973_v61 = vpack.c.bf16 %v949_v56, %v947_v55 }
  0x68   :  { %255 = vmatmul.mubr.bf16.gmra.mrb[24].mxu0 %v71_v1  ;;  %514 = vmatmul.mubr.bf16.gmra.mrb[24].mxu1 %v333_v2  ;;  %v628_v1 = vld [vmem:[#allocation2 + $0x240] sm:$0xff]  ;;  %v630_v2 = vld [vmem:[#allocation2 + $0x250] sm:$0xff] }
  0x69   :  { %1290 = vmatprep.mubr.msk.bf16.mxu0 %vm143_vm0, %v74_v3  ;;  %1324 = vmatprep.mubr.msk.bf16.mxu1 %vm143_vm0, %v336_v4  ;;  %v951_v3 = vld [vmem:[#allocation2 + $0x260] sm:$0xff]  ;;  %v953_v4 = vld [vmem:[#allocation2 + $0x270] sm:$0xff]  ;;  %v652_v9 = vpack.c.bf16 %v630_v2, %v628_v1 }
  0x6a   :  { %v975_v10 = vpack.c.bf16 %v953_v4, %v951_v3 }
  0x70   :  { %263 = vmatmul.mubr.bf16.gmra.mrb[28].mxu0 %v73_v13  ;;  %522 = vmatmul.mubr.bf16.gmra.mrb[28].mxu1 %v335_v14  ;;  %v632_v13 = vld [vmem:[#allocation2 + $0x2c0] sm:$0xff]  ;;  %v634_v14 = vld [vmem:[#allocation2 + $0x2d0] sm:$0xff] }
  0x71   :  { %1351 = vmatprep.mubr.msk.bf16.mxu0 %vm143_vm0, %v645_v15  ;;  %1385 = vmatprep.mubr.msk.bf16.mxu1 %vm143_vm0, %v968_v16  ;;  %v955_v15 = vld [vmem:[#allocation2 + $0x2e0] sm:$0xff]  ;;  %v957_v16 = vld [vmem:[#allocation2 + $0x2f0] sm:$0xff]  ;;  %v654_v21 = vpack.c.bf16 %v634_v14, %v632_v13 }
  0x72   :  { %v977_v22 = vpack.c.bf16 %v957_v16, %v955_v15 }
  0x78   :  { %789 = vmatmul.mubr.bf16.vlgmr.msra.gmra.mrb[32].mxu0 %v644_v26  ;;  %1112 = vmatmul.mubr.bf16.vlgmr.msra.gmra.mrb[32].mxu1 %v967_v27  ;;  %v636_v26 = vld [vmem:[#allocation2 + $0x340] sm:$0xff]  ;;  %v638_v27 = vld [vmem:[#allocation2 + $0x350] sm:$0xff] }
  0x79   :  { %1352 = vmatprep.mubr.msk.bf16.mxu0 %vm143_vm0, %v647_v28  ;;  %1386 = vmatprep.mubr.msk.bf16.mxu1 %vm143_vm0, %v970_v29  ;;  %v959_v28 = vld [vmem:[#allocation2 + $0x360] sm:$0xff]  ;;  %v961_v29 = vld [vmem:[#allocation2 + $0x370] sm:$0xff]  ;;  %v656_v34 = vpack.c.bf16 %v638_v27, %v636_v26 }
  0x7a   :  { %v979_v35 = vpack.c.bf16 %v961_v29, %v959_v28 }
  0x80   :  { %797 = vmatmul.mubr.bf16.gmra.mrb[36].mxu0 %v646_v38  ;;  %1120 = vmatmul.mubr.bf16.gmra.mrb[36].mxu1 %v969_v39  ;;  %v640_v38 = vld [vmem:[#allocation2 + $0x3c0] sm:$0xff]  ;;  %v642_v39 = vld [vmem:[#allocation2 + $0x3d0] sm:$0xff] }
  0x81   :  { %1353 = vmatprep.mubr.msk.bf16.mxu0 %vm143_vm0, %v649_v40  ;;  %1387 = vmatprep.mubr.msk.bf16.mxu1 %vm143_vm0, %v972_v41  ;;  %v963_v40 = vld [vmem:[#allocation2 + $0x3e0] sm:$0xff]  ;;  %v965_v41 = vld [vmem:[#allocation2 + $0x3f0] sm:$0xff]  ;;  %v658_v42 = vpack.c.bf16 %v642_v39, %v640_v38 }
  0x82   :  { %v981_v43 = vpack.c.bf16 %v965_v41, %v963_v40 }
  0x88   :  { %805 = vmatmul.mubr.bf16.gmra.mrb[40].mxu0 %v648_v50  ;;  %1128 = vmatmul.mubr.bf16.gmra.mrb[40].mxu1 %v971_v51 }
  0x89   :  { %1354 = vmatprep.mubr.msk.bf16.mxu0 %vm143_vm0, %v651_v52  ;;  %1388 = vmatprep.mubr.msk.bf16.mxu1 %vm143_vm0, %v974_v53 }
  0x90   :  { %813 = vmatmul.mubr.bf16.gmra.mrb[44].mxu0 %v650_v60  ;;  %1136 = vmatmul.mubr.bf16.gmra.mrb[44].mxu1 %v973_v61 }
  0x91   :  { %1355 = vmatprep.mubr.msk.bf16.mxu0 %vm143_vm0, %v653_v62  ;;  %1389 = vmatprep.mubr.msk.bf16.mxu1 %vm143_vm0, %v976_v63 }
  0x98   :  { %821 = vmatmul.mubr.bf16.gmra.mrb[48].mxu0 %v652_v9  ;;  %1144 = vmatmul.mubr.bf16.gmra.mrb[48].mxu1 %v975_v10 }
  0x99   :  { %1356 = vmatprep.mubr.msk.bf16.mxu0 %vm143_vm0, %v655_v11  ;;  %1390 = vmatprep.mubr.msk.bf16.mxu1 %vm143_vm0, %v978_v12 }
  0xa0   :  { %829 = vmatmul.mubr.bf16.gmra.mrb[52].mxu0 %v654_v21  ;;  %1152 = vmatmul.mubr.bf16.gmra.mrb[52].mxu1 %v977_v22 }
  0xa1   :  { %1357 = vmatprep.mubr.msk.bf16.mxu0 %vm143_vm0, %v657_v23  ;;  %1391 = vmatprep.mubr.msk.bf16.mxu1 %vm143_vm0, %v980_v25 }
  0xa8   :  { %837 = vmatmul.mubr.bf16.gmra.mrb[56].mxu0 %v656_v34  ;;  %1160 = vmatmul.mubr.bf16.gmra.mrb[56].mxu1 %v979_v35 }
  0xa9   :  { %1358 = vmatprep.mubr.msk.bf16.mxu0 %vm143_vm0, %v659_v36  ;;  %1392 = vmatprep.mubr.msk.bf16.mxu1 %vm143_vm0, %v982_v37 }
  0xb0   :  { %845 = vmatmul.mubr.bf16.gmra.mrb[60].mxu0 %v658_v42  ;;  %1168 = vmatmul.mubr.bf16.gmra.mrb[60].mxu1 %v981_v43 }
 0x10b   :  { %v208_v44 = vpop.f32.mrb[0].mxu0  ;;  %v467_v46 = vpop.f32.mrb[0].mxu1 }
 0x10c   :  { %272 = vst.msk [vmem:[#allocation5] sm:$0xff] %vm271_vm2, %v208_v44  ;;  %v210_v45 = vpop.f32.mrb[1].mxu0  ;;  %546 = vrot.lane.b32.xlu0 %v467_v46, %s1491_s1  ;;  %v469_v48 = vpop.f32.mrb[1].mxu1 }
 0x10d   :  { %v211_v47 = vpop.f32.mrb[2].mxu0  ;;  %v470_v50 = vpop.f32.mrb[2].mxu1 }
 0x10e   :  { %273 = vst.msk [vmem:[#allocation5 + $0x8] sm:$0xff] %vm271_vm2, %v211_v47  ;;  %v213_v49 = vpop.f32.mrb[3].mxu0  ;;  %v472_v51 = vpop.f32.mrb[3].mxu1 }
 0x110   :  { %548 = vrot.lane.b32.xlu0 %v470_v50, %s1491_s1 }
 0x113   :  { %v216_v52 = vpop.f32.mrb[4].mxu0  ;;  %v475_v54 = vpop.f32.mrb[4].mxu1 }
 0x114   :  { %274 = vst.msk [vmem:[#allocation5 + $0x10] sm:$0xff] %vm271_vm2, %v216_v52  ;;  %v218_v53 = vpop.f32.mrb[5].mxu0  ;;  %550 = vrot.lane.b32.xlu1 %v475_v54, %s1491_s1  ;;  %v477_v55 = vpop.f32.mrb[5].mxu1 }
 0x115   :  { %v219_v24 = vpop.f32.mrb[6].mxu0  ;;  %v478_v0 = vpop.f32.mrb[6].mxu1 }
 0x116   :  { %275 = vst.msk [vmem:[#allocation5 + $0x18] sm:$0xff] %vm271_vm2, %v219_v24  ;;  %v221_v56 = vpop.f32.mrb[7].mxu0  ;;  %v480_v57 = vpop.f32.mrb[7].mxu1 }
 0x118   :  { %552 = vrot.lane.b32.xlu1 %v478_v0, %s1491_s1 }
 0x11b   :  { %v224_v58 = vpop.f32.mrb[8].mxu0  ;;  %v483_v60 = vpop.f32.mrb[8].mxu1 }
 0x11c   :  { %276 = vst.msk [vmem:[#allocation5 + $0x20] sm:$0xff] %vm271_vm2, %v224_v58  ;;  %v226_v59 = vpop.f32.mrb[9].mxu0  ;;  %v485_v62 = vpop.f32.mrb[9].mxu1  ;;  %554 = vrot.lane.b32.xlu0 %v483_v60, %s1491_s1 }
 0x11d   :  { %v227_v61 = vpop.f32.mrb[10].mxu0  ;;  %v486_v1 = vpop.f32.mrb[10].mxu1 }
 0x11e   :  { %277 = vst.msk [vmem:[#allocation5 + $0x28] sm:$0xff] %vm271_vm2, %v227_v61  ;;  %v229_v63 = vpop.f32.mrb[11].mxu0  ;;  %v488_v2 = vpop.f32.mrb[11].mxu1  ;;  %556 = vrot.lane.b32.xlu1 %v486_v1, %s1491_s1 }
 0x123   :  { %v232_v3 = vpop.f32.mrb[12].mxu0  ;;  %v491_v5 = vpop.f32.mrb[12].mxu1 }
 0x124   :  { %278 = vst.msk [vmem:[#allocation5 + $0x30] sm:$0xff] %vm271_vm2, %v232_v3  ;;  %v234_v4 = vpop.f32.mrb[13].mxu0  ;;  %v493_v7 = vpop.f32.mrb[13].mxu1  ;;  %558 = vrot.lane.b32.xlu0 %v491_v5, %s1491_s1 }
 0x125   :  { %v235_v6 = vpop.f32.mrb[14].mxu0  ;;  %v494_v9 = vpop.f32.mrb[14].mxu1 }
 0x126   :  { %279 = vst.msk [vmem:[#allocation5 + $0x38] sm:$0xff] %vm271_vm2, %v235_v6  ;;  %v237_v8 = vpop.f32.mrb[15].mxu0  ;;  %v496_v10 = vpop.f32.mrb[15].mxu1  ;;  %560 = vrot.lane.b32.xlu1 %v494_v9, %s1491_s1 }
 0x12b   :  { %v240_v11 = vpop.f32.mrb[16].mxu0  ;;  %v499_v13 = vpop.f32.mrb[16].mxu1 }
 0x12c   :  { %280 = vst.msk [vmem:[#allocation5 + $0x40] sm:$0xff] %vm271_vm2, %v240_v11  ;;  %v242_v12 = vpop.f32.mrb[17].mxu0  ;;  %v501_v15 = vpop.f32.mrb[17].mxu1  ;;  %562 = vrot.lane.b32.xlu0 %v499_v13, %s1491_s1 }
 0x12d   :  { %v243_v14 = vpop.f32.mrb[18].mxu0  ;;  %v502_v17 = vpop.f32.mrb[18].mxu1 }
 0x12e   :  { %281 = vst.msk [vmem:[#allocation5 + $0x48] sm:$0xff] %vm271_vm2, %v243_v14  ;;  %v245_v16 = vpop.f32.mrb[19].mxu0  ;;  %v504_v18 = vpop.f32.mrb[19].mxu1  ;;  %564 = vrot.lane.b32.xlu1 %v502_v17, %s1491_s1 }
 0x133   :  { %v248_v19 = vpop.f32.mrb[20].mxu0  ;;  %v507_v21 = vpop.f32.mrb[20].mxu1 }
 0x134   :  { %282 = vst.msk [vmem:[#allocation5 + $0x50] sm:$0xff] %vm271_vm2, %v248_v19  ;;  %v250_v20 = vpop.f32.mrb[21].mxu0  ;;  %v509_v23 = vpop.f32.mrb[21].mxu1  ;;  %566 = vrot.lane.b32.xlu0 %v507_v21, %s1491_s1 }
 0x135   :  { %v251_v22 = vpop.f32.mrb[22].mxu0  ;;  %v510_v26 = vpop.f32.mrb[22].mxu1 }
 0x136   :  { %283 = vst.msk [vmem:[#allocation5 + $0x58] sm:$0xff] %vm271_vm2, %v251_v22  ;;  %v253_v25 = vpop.f32.mrb[23].mxu0  ;;  %v512_v27 = vpop.f32.mrb[23].mxu1  ;;  %568 = vrot.lane.b32.xlu1 %v510_v26, %s1491_s1 }
 0x13b   :  { %v256_v28 = vpop.f32.mrb[24].mxu0  ;;  %v515_v30 = vpop.f32.mrb[24].mxu1 }
 0x13c   :  { %284 = vst.msk [vmem:[#allocation5 + $0x60] sm:$0xff] %vm271_vm2, %v256_v28  ;;  %v258_v29 = vpop.f32.mrb[25].mxu0  ;;  %v517_v32 = vpop.f32.mrb[25].mxu1  ;;  %570 = vrot.lane.b32.xlu0 %v515_v30, %s1491_s1 }
 0x13d   :  { %v259_v31 = vpop.f32.mrb[26].mxu0  ;;  %v518_v34 = vpop.f32.mrb[26].mxu1 }
 0x13e   :  { %285 = vst.msk [vmem:[#allocation5 + $0x68] sm:$0xff] %vm271_vm2, %v259_v31  ;;  %v261_v33 = vpop.f32.mrb[27].mxu0  ;;  %v520_v35 = vpop.f32.mrb[27].mxu1  ;;  %572 = vrot.lane.b32.xlu1 %v518_v34, %s1491_s1 }
 0x143   :  { %v264_v36 = vpop.f32.mrb[28].mxu0  ;;  %v523_v38 = vpop.f32.mrb[28].mxu1 }
 0x144   :  { %286 = vst.msk [vmem:[#allocation5 + $0x70] sm:$0xff] %vm271_vm2, %v264_v36  ;;  %v266_v37 = vpop.f32.mrb[29].mxu0  ;;  %v525_v40 = vpop.f32.mrb[29].mxu1  ;;  %574 = vrot.lane.b32.xlu0 %v523_v38, %s1491_s1 }
 0x145   :  { %v267_v39 = vpop.f32.mrb[30].mxu0  ;;  %v526_v42 = vpop.f32.mrb[30].mxu1 }
 0x146   :  { %287 = vst.msk [vmem:[#allocation5 + $0x78] sm:$0xff] %vm271_vm2, %v267_v39  ;;  %v269_v41 = vpop.f32.mrb[31].mxu0  ;;  %v528_v43 = vpop.f32.mrb[31].mxu1  ;;  %576 = vrot.lane.b32.xlu1 %v526_v42, %s1491_s1 }
 0x14b   :  { %v790_v44 = vpop.f32.mrb[32].mxu0  ;;  %v1113_v46 = vpop.f32.mrb[32].mxu1 }
 0x14c   :  { %v792_v45 = vpop.f32.mrb[33].mxu0  ;;  %869 = vrot.lane.b32.xlu0 %v790_v44, %s1492_s8  ;;  %v1115_v48 = vpop.f32.mrb[33].mxu1 }
 0x14d   :  { %v793_v47 = vpop.f32.mrb[34].mxu0  ;;  %v1116_v50 = vpop.f32.mrb[34].mxu1 }
 0x14e   :  { %871 = vrot.lane.b32.xlu1 %v793_v47, %s1492_s8  ;;  %v795_v49 = vpop.f32.mrb[35].mxu0  ;;  %v1118_v51 = vpop.f32.mrb[35].mxu1 }
 0x150   :  { %1192 = vrot.lane.b32.xlu0 %v1113_v46, %s1493_s9 }
 0x152   :  { %1194 = vrot.lane.b32.xlu1 %v1116_v50, %s1493_s9 }
 0x153   :  { %v798_v52 = vpop.f32.mrb[36].mxu0  ;;  %v1121_v54 = vpop.f32.mrb[36].mxu1 }
 0x154   :  { %v800_v53 = vpop.f32.mrb[37].mxu0  ;;  %873 = vrot.lane.b32.xlu0 %v798_v52, %s1492_s8  ;;  %v1123_v55 = vpop.f32.mrb[37].mxu1 }
 0x155   :  { %v801_v24 = vpop.f32.mrb[38].mxu0  ;;  %v1124_v0 = vpop.f32.mrb[38].mxu1 }
 0x156   :  { %875 = vrot.lane.b32.xlu1 %v801_v24, %s1492_s8  ;;  %v803_v56 = vpop.f32.mrb[39].mxu0  ;;  %v1126_v57 = vpop.f32.mrb[39].mxu1 }
 0x158   :  { %1196 = vrot.lane.b32.xlu0 %v1121_v54, %s1493_s9 }
 0x15a   :  { %1198 = vrot.lane.b32.xlu1 %v1124_v0, %s1493_s9 }
 0x15b   :  { %v806_v58 = vpop.f32.mrb[40].mxu0  ;;  %v1129_v60 = vpop.f32.mrb[40].mxu1 }
 0x15c   :  { %v808_v59 = vpop.f32.mrb[41].mxu0  ;;  %877 = vrot.lane.b32.xlu0 %v806_v58, %s1492_s8  ;;  %v1131_v62 = vpop.f32.mrb[41].mxu1 }
 0x15d   :  { %v809_v61 = vpop.f32.mrb[42].mxu0  ;;  %v1132_v1 = vpop.f32.mrb[42].mxu1 }
 0x15e   :  { %879 = vrot.lane.b32.xlu1 %v809_v61, %s1492_s8  ;;  %v811_v63 = vpop.f32.mrb[43].mxu0  ;;  %v1134_v2 = vpop.f32.mrb[43].mxu1 }
 0x160   :  { %1200 = vrot.lane.b32.xlu0 %v1129_v60, %s1493_s9 }
 0x162   :  { %1202 = vrot.lane.b32.xlu1 %v1132_v1, %s1493_s9 }
 0x163   :  { %v814_v3 = vpop.f32.mrb[44].mxu0  ;;  %v1137_v5 = vpop.f32.mrb[44].mxu1 }
 0x164   :  { %v816_v4 = vpop.f32.mrb[45].mxu0  ;;  %881 = vrot.lane.b32.xlu0 %v814_v3, %s1492_s8  ;;  %v1139_v7 = vpop.f32.mrb[45].mxu1 }
 0x165   :  { %v817_v6 = vpop.f32.mrb[46].mxu0  ;;  %v1140_v9 = vpop.f32.mrb[46].mxu1 }
 0x166   :  { %883 = vrot.lane.b32.xlu1 %v817_v6, %s1492_s8  ;;  %v819_v8 = vpop.f32.mrb[47].mxu0  ;;  %v1142_v10 = vpop.f32.mrb[47].mxu1 }
 0x168   :  { %1204 = vrot.lane.b32.xlu0 %v1137_v5, %s1493_s9 }
 0x16a   :  { %1206 = vrot.lane.b32.xlu1 %v1140_v9, %s1493_s9 }
 0x16b   :  { %v822_v11 = vpop.f32.mrb[48].mxu0  ;;  %v1145_v13 = vpop.f32.mrb[48].mxu1 }
 0x16c   :  { %v824_v12 = vpop.f32.mrb[49].mxu0  ;;  %885 = vrot.lane.b32.xlu0 %v822_v11, %s1492_s8  ;;  %v1147_v15 = vpop.f32.mrb[49].mxu1 }
 0x16d   :  { %v825_v14 = vpop.f32.mrb[50].mxu0  ;;  %v1148_v17 = vpop.f32.mrb[50].mxu1 }
 0x16e   :  { %887 = vrot.lane.b32.xlu1 %v825_v14, %s1492_s8  ;;  %v827_v16 = vpop.f32.mrb[51].mxu0  ;;  %v1150_v18 = vpop.f32.mrb[51].mxu1 }
 0x170   :  { %1208 = vrot.lane.b32.xlu0 %v1145_v13, %s1493_s9 }
 0x172   :  { %1210 = vrot.lane.b32.xlu1 %v1148_v17, %s1493_s9 }
 0x173   :  { %v830_v19 = vpop.f32.mrb[52].mxu0  ;;  %v1153_v21 = vpop.f32.mrb[52].mxu1 }
 0x174   :  { %v832_v20 = vpop.f32.mrb[53].mxu0  ;;  %889 = vrot.lane.b32.xlu0 %v830_v19, %s1492_s8  ;;  %v1155_v23 = vpop.f32.mrb[53].mxu1 }
 0x175   :  { %v833_v22 = vpop.f32.mrb[54].mxu0  ;;  %v1156_v26 = vpop.f32.mrb[54].mxu1 }
 0x176   :  { %891 = vrot.lane.b32.xlu1 %v833_v22, %s1492_s8  ;;  %v835_v25 = vpop.f32.mrb[55].mxu0  ;;  %v1158_v27 = vpop.f32.mrb[55].mxu1 }
 0x178   :  { %1212 = vrot.lane.b32.xlu0 %v1153_v21, %s1493_s9 }
 0x17a   :  { %1214 = vrot.lane.b32.xlu1 %v1156_v26, %s1493_s9 }
 0x17b   :  { %v838_v28 = vpop.f32.mrb[56].mxu0  ;;  %v1161_v30 = vpop.f32.mrb[56].mxu1 }
 0x17c   :  { %v840_v29 = vpop.f32.mrb[57].mxu0  ;;  %893 = vrot.lane.b32.xlu0 %v838_v28, %s1492_s8  ;;  %v1163_v32 = vpop.f32.mrb[57].mxu1 }
 0x17d   :  { %v841_v31 = vpop.f32.mrb[58].mxu0  ;;  %v1164_v34 = vpop.f32.mrb[58].mxu1 }
 0x17e   :  { %895 = vrot.lane.b32.xlu1 %v841_v31, %s1492_s8  ;;  %v843_v33 = vpop.f32.mrb[59].mxu0  ;;  %v547_v35 = vpop.permute.xlu0 %546 }
 0x17f   :  { %v1166_v36 = vpop.f32.mrb[59].mxu1  ;;  %595 = vst.msk [vmem:[#allocation5] sm:$0xff] %vm594_vm3, %v547_v35 }
 0x180   :  { %1216 = vrot.lane.b32.xlu0 %v1161_v30, %s1493_s9 }
 0x182   :  { %1218 = vrot.lane.b32.xlu1 %v1164_v34, %s1493_s9  ;;  %v549_v37 = vpop.permute.xlu0 %548 }
 0x183   :  { %v846_v38 = vpop.f32.mrb[60].mxu0  ;;  %596 = vst.msk [vmem:[#allocation5 + $0x8] sm:$0xff] %vm594_vm3, %v549_v37  ;;  %v1169_v40 = vpop.f32.mrb[60].mxu1 }
 0x184   :  { %v848_v39 = vpop.f32.mrb[61].mxu0  ;;  %897 = vrot.lane.b32.xlu0 %v846_v38, %s1492_s8  ;;  %v1171_v42 = vpop.f32.mrb[61].mxu1 }
 0x185   :  { %v849_v41 = vpop.f32.mrb[62].mxu0  ;;  %v1172_v44 = vpop.f32.mrb[62].mxu1 }
 0x186   :  { %899 = vrot.lane.b32.xlu1 %v849_v41, %s1492_s8  ;;  %v851_v43 = vpop.f32.mrb[63].mxu0  ;;  %v551_v45 = vpop.permute.xlu1 %550 }
 0x187   :  { %v1174_v46 = vpop.f32.mrb[63].mxu1  ;;  %597 = vst.msk [vmem:[#allocation5 + $0x10] sm:$0xff] %vm594_vm3, %v551_v45 }
 0x188   :  { %1220 = vrot.lane.b32.xlu0 %v1169_v40, %s1493_s9 }
 0x18a   :  { %1222 = vrot.lane.b32.xlu1 %v1172_v44, %s1493_s9  ;;  %v553_v47 = vpop.permute.xlu1 %552 }
 0x18b   :  { %598 = vst.msk [vmem:[#allocation5 + $0x18] sm:$0xff] %vm594_vm3, %v553_v47 }
 0x18e   :  { %v555_v48 = vpop.permute.xlu0 %554 }
 0x18f   :  { %599 = vst.msk [vmem:[#allocation5 + $0x20] sm:$0xff] %vm594_vm3, %v555_v48 }
 0x190   :  { %v557_v49 = vpop.permute.xlu1 %556 }
 0x191   :  { %600 = vst.msk [vmem:[#allocation5 + $0x28] sm:$0xff] %vm594_vm3, %v557_v49 }
 0x196   :  { %v559_v50 = vpop.permute.xlu0 %558 }
 0x197   :  { %601 = vst.msk [vmem:[#allocation5 + $0x30] sm:$0xff] %vm594_vm3, %v559_v50 }
 0x198   :  { %v561_v51 = vpop.permute.xlu1 %560 }
 0x199   :  { %602 = vst.msk [vmem:[#allocation5 + $0x38] sm:$0xff] %vm594_vm3, %v561_v51 }
 0x19e   :  { %v563_v52 = vpop.permute.xlu0 %562 }
 0x19f   :  { %603 = vst.msk [vmem:[#allocation5 + $0x40] sm:$0xff] %vm594_vm3, %v563_v52 }
 0x1a0   :  { %v565_v53 = vpop.permute.xlu1 %564 }
 0x1a1   :  { %604 = vst.msk [vmem:[#allocation5 + $0x48] sm:$0xff] %vm594_vm3, %v565_v53 }
 0x1a6   :  { %v567_v54 = vpop.permute.xlu0 %566 }
 0x1a7   :  { %605 = vst.msk [vmem:[#allocation5 + $0x50] sm:$0xff] %vm594_vm3, %v567_v54 }
 0x1a8   :  { %v569_v24 = vpop.permute.xlu1 %568 }
 0x1a9   :  { %606 = vst.msk [vmem:[#allocation5 + $0x58] sm:$0xff] %vm594_vm3, %v569_v24 }
 0x1ae   :  { %v571_v55 = vpop.permute.xlu0 %570 }
 0x1af   :  { %607 = vst.msk [vmem:[#allocation5 + $0x60] sm:$0xff] %vm594_vm3, %v571_v55 }
 0x1b0   :  { %v573_v56 = vpop.permute.xlu1 %572 }
 0x1b1   :  { %608 = vst.msk [vmem:[#allocation5 + $0x68] sm:$0xff] %vm594_vm3, %v573_v56 }
 0x1b6   :  { %v575_v0 = vpop.permute.xlu0 %574 }
 0x1b7   :  { %609 = vst.msk [vmem:[#allocation5 + $0x70] sm:$0xff] %vm594_vm3, %v575_v0 }
 0x1b8   :  { %v577_v57 = vpop.permute.xlu1 %576 }
 0x1b9   :  { %610 = vst.msk [vmem:[#allocation5 + $0x78] sm:$0xff] %vm594_vm3, %v577_v57 }
 0x1be   :  { %v870_v58 = vpop.permute.xlu0 %869 }
 0x1bf   :  { %918 = vst.msk [vmem:[#allocation5] sm:$0xff] %vm917_vm4, %v870_v58 }
 0x1c0   :  { %v872_v59 = vpop.permute.xlu1 %871 }
 0x1c1   :  { %919 = vst.msk [vmem:[#allocation5 + $0x8] sm:$0xff] %vm917_vm4, %v872_v59 }
 0x1c2   :  { %v1193_v60 = vpop.permute.xlu0 %1192 }
 0x1c3   :  { %1241 = vst.msk [vmem:[#allocation5] sm:$0xff] %vm1240_vm5, %v1193_v60 }
 0x1c4   :  { %v1195_v61 = vpop.permute.xlu1 %1194 }
 0x1c5   :  { %1242 = vst.msk [vmem:[#allocation5 + $0x8] sm:$0xff] %vm1240_vm5, %v1195_v61 }
 0x1c6   :  { %v874_v62 = vpop.permute.xlu0 %873 }
 0x1c7   :  { %920 = vst.msk [vmem:[#allocation5 + $0x10] sm:$0xff] %vm917_vm4, %v874_v62 }
 0x1c8   :  { %v876_v63 = vpop.permute.xlu1 %875 }
 0x1c9   :  { %921 = vst.msk [vmem:[#allocation5 + $0x18] sm:$0xff] %vm917_vm4, %v876_v63 }
 0x1ca   :  { %v1197_v1 = vpop.permute.xlu0 %1196 }
 0x1cb   :  { %1243 = vst.msk [vmem:[#allocation5 + $0x10] sm:$0xff] %vm1240_vm5, %v1197_v1 }
 0x1cc   :  { %v1199_v2 = vpop.permute.xlu1 %1198 }
 0x1cd   :  { %1244 = vst.msk [vmem:[#allocation5 + $0x18] sm:$0xff] %vm1240_vm5, %v1199_v2 }
 0x1ce   :  { %v878_v3 = vpop.permute.xlu0 %877 }
 0x1cf   :  { %922 = vst.msk [vmem:[#allocation5 + $0x20] sm:$0xff] %vm917_vm4, %v878_v3 }
 0x1d0   :  { %v880_v4 = vpop.permute.xlu1 %879 }
 0x1d1   :  { %923 = vst.msk [vmem:[#allocation5 + $0x28] sm:$0xff] %vm917_vm4, %v880_v4 }
 0x1d2   :  { %v1201_v5 = vpop.permute.xlu0 %1200 }
 0x1d3   :  { %1245 = vst.msk [vmem:[#allocation5 + $0x20] sm:$0xff] %vm1240_vm5, %v1201_v5 }
 0x1d4   :  { %v1203_v6 = vpop.permute.xlu1 %1202 }
 0x1d5   :  { %1246 = vst.msk [vmem:[#allocation5 + $0x28] sm:$0xff] %vm1240_vm5, %v1203_v6 }
 0x1d6   :  { %v882_v7 = vpop.permute.xlu0 %881 }
 0x1d7   :  { %924 = vst.msk [vmem:[#allocation5 + $0x30] sm:$0xff] %vm917_vm4, %v882_v7 }
 0x1d8   :  { %v884_v8 = vpop.permute.xlu1 %883 }
 0x1d9   :  { %925 = vst.msk [vmem:[#allocation5 + $0x38] sm:$0xff] %vm917_vm4, %v884_v8 }
 0x1da   :  { %v1205_v9 = vpop.permute.xlu0 %1204 }
 0x1db   :  { %1247 = vst.msk [vmem:[#allocation5 + $0x30] sm:$0xff] %vm1240_vm5, %v1205_v9 }
 0x1dc   :  { %v1207_v10 = vpop.permute.xlu1 %1206 }
 0x1dd   :  { %1248 = vst.msk [vmem:[#allocation5 + $0x38] sm:$0xff] %vm1240_vm5, %v1207_v10 }
 0x1de   :  { %v886_v11 = vpop.permute.xlu0 %885 }
 0x1df   :  { %926 = vst.msk [vmem:[#allocation5 + $0x40] sm:$0xff] %vm917_vm4, %v886_v11 }
 0x1e0   :  { %v888_v12 = vpop.permute.xlu1 %887 }
 0x1e1   :  { %927 = vst.msk [vmem:[#allocation5 + $0x48] sm:$0xff] %vm917_vm4, %v888_v12 }
 0x1e2   :  { %v1209_v13 = vpop.permute.xlu0 %1208 }
 0x1e3   :  { %1249 = vst.msk [vmem:[#allocation5 + $0x40] sm:$0xff] %vm1240_vm5, %v1209_v13 }
 0x1e4   :  { %v1211_v14 = vpop.permute.xlu1 %1210 }
 0x1e5   :  { %1250 = vst.msk [vmem:[#allocation5 + $0x48] sm:$0xff] %vm1240_vm5, %v1211_v14 }
 0x1e6   :  { %v890_v15 = vpop.permute.xlu0 %889 }
 0x1e7   :  { %928 = vst.msk [vmem:[#allocation5 + $0x50] sm:$0xff] %vm917_vm4, %v890_v15 }
 0x1e8   :  { %v892_v16 = vpop.permute.xlu1 %891 }
 0x1e9   :  { %929 = vst.msk [vmem:[#allocation5 + $0x58] sm:$0xff] %vm917_vm4, %v892_v16 }
 0x1ea   :  { %v1213_v17 = vpop.permute.xlu0 %1212 }
 0x1eb   :  { %1251 = vst.msk [vmem:[#allocation5 + $0x50] sm:$0xff] %vm1240_vm5, %v1213_v17 }
 0x1ec   :  { %v1215_v18 = vpop.permute.xlu1 %1214 }
 0x1ed   :  { %1252 = vst.msk [vmem:[#allocation5 + $0x58] sm:$0xff] %vm1240_vm5, %v1215_v18 }
 0x1ee   :  { %v894_v19 = vpop.permute.xlu0 %893 }
 0x1ef   :  { %930 = vst.msk [vmem:[#allocation5 + $0x60] sm:$0xff] %vm917_vm4, %v894_v19 }
 0x1f0   :  { %v896_v20 = vpop.permute.xlu1 %895 }
 0x1f1   :  { %931 = vst.msk [vmem:[#allocation5 + $0x68] sm:$0xff] %vm917_vm4, %v896_v20 }
 0x1f2   :  { %v1217_v21 = vpop.permute.xlu0 %1216 }
 0x1f3   :  { %1253 = vst.msk [vmem:[#allocation5 + $0x60] sm:$0xff] %vm1240_vm5, %v1217_v21 }
 0x1f4   :  { %v1219_v22 = vpop.permute.xlu1 %1218 }
 0x1f5   :  { %1254 = vst.msk [vmem:[#allocation5 + $0x68] sm:$0xff] %vm1240_vm5, %v1219_v22 }
 0x1f6   :  { %v898_v23 = vpop.permute.xlu0 %897 }
 0x1f7   :  { %932 = vst.msk [vmem:[#allocation5 + $0x70] sm:$0xff] %vm917_vm4, %v898_v23 }
 0x1f8   :  { %v900_v25 = vpop.permute.xlu1 %899 }
 0x1f9   :  { %933 = vst.msk [vmem:[#allocation5 + $0x78] sm:$0xff] %vm917_vm4, %v900_v25 }
 0x1fa   :  { %v1221_v26 = vpop.permute.xlu0 %1220 }
 0x1fb   :  { %1255 = vst.msk [vmem:[#allocation5 + $0x70] sm:$0xff] %vm1240_vm5, %v1221_v26 }
 0x1fc   :  { %v1223_v27 = vpop.permute.xlu1 %1222 }
 0x1fd   :  { %1256 = vst.msk [vmem:[#allocation5 + $0x78] sm:$0xff] %vm1240_vm5, %v1223_v27 }
 0x1fe   :  { %1472 = shalt.err (!%p1469_p12)
}
 0x1ff   :  { %s1473_s15 = scalar_lea.hbm %s1833_s2, 2048 }
 0x200   :  { %p1474_p13 = scmp.ne.s32.totalorder %s1833_s2, %s1473_s15  ;;  %p1477_p0 = scmp.lt.u32.totalorder %s1473_s15, %s1833_s2 }
 0x202   :  { %p1479_p1 = pnand %p1477_p0, %p1474_p13 }
 0x204   :  { %1482 = shalt.err (!%p1479_p1)
}
 0x205   :  { %s1495_s20 = smov 128   ;;  %s1496_s21 = smov 8  }
 0x206   :  { %1268 = dma.vmem_to_hbm [thread:$0]  %s1263_s11, 2048, %s1833_s2, [#allocation4], %s1495_s20, %s1495_s20, %s1496_s21  }
 0x207   :  { %1485 = dma.done.wait [#allocation4], 2048  }
 0x208   :  { %1486 = vsyncadd [#allocation4], 4294965248 }
 0x209   :  { %1272 = vsyncpa [#allocation3], 1 }
 0x20a   :  { %1273 = vsyncpa [#allocation4], 1 }

</bundles_post_ra>
